<compile_context>
chip_gen: v7x
topology: tpu7x:2x2x1
jax: 0.10.0
libtpu: 0.0.40
codegen_flags: <defaults>
</compile_context>

<pallas_src>
import functools

import jax
import jax.numpy as jnp
from jax.experimental import pallas as pl
from jax.experimental.pallas import tpu as pltpu


def _probing_kernel(inv_t):
    """Kernel body with the static 1/T mean scale baked in."""

    def kernel(layer_ref, x_ref, w1_ref, b1_ref, w2_ref, b2_ref, out_ref,
               acc_ref):
        # layer_ref: (1,) i32 SMEM (scalar prefetch; only the index_maps use it)
        # x_ref:     (TB, TT, F) f32  -- probed layer, layer axis squeezed
        # w1_ref:    (F, H)  bf16     b1_ref: (1, H)  f32
        # w2_ref:    (H, NP) bf16     b2_ref: (1, NP) f32
        # out_ref:   (TB, NP) f32     acc_ref: (TB, F) f32 scratch (time-sum)
        del layer_ref
        t = pl.program_id(1)

        @pl.when(t == 0)
        def _init():
            acc_ref[...] = jnp.zeros_like(acc_ref)

        # f32 time-sum straight off the f32 DMA (no wrapper-side cast pass).
        acc_ref[...] += jnp.sum(x_ref[...], axis=1)

        @pl.when(t == pl.num_programs(1) - 1)
        def _finish():
            feat = acc_ref[...].astype(jnp.bfloat16)                # (TB, F)
            h = jnp.dot(feat, w1_ref[...],
                        preferred_element_type=jnp.float32)         # (TB, H)
            # Fold the 1/T mean onto the narrow (TB, H) activations.
            h = jnp.maximum(h * inv_t + b1_ref[...], 0.0)           # ReLU
            logits = jnp.dot(h.astype(jnp.bfloat16), w2_ref[...],
                             preferred_element_type=jnp.float32)    # (TB, NP)
            out_ref[...] = (logits + b2_ref[...]).astype(out_ref.dtype)

    return kernel


def _tile_candidates(n):
    """Divisors of n that are multiples of 8, plus n itself (full extent)."""
    cands = {d for d in range(8, n + 1, 8) if n % d == 0}
    cands.add(n)
    return sorted(cands)


def _pick_tiles(batch, time, feat, itemsize, budget_bytes):
    """Largest (tb, tt) whose x block fits `budget_bytes`.

    Keeps >= 2 batch tiles whenever `batch` allows it so the 'parallel' grid
    axis can shard across both v7x TensorCores; on v5e/v6e this is harmless.
    """
    tb_all = _tile_candidates(batch)
    tb_pref = [d for d in tb_all if batch // d >= 2] or tb_all
    tt_all = _tile_candidates(time)
    best = None
    for tb in tb_pref:
        for tt in tt_all:
            blk = tb * tt * feat * itemsize
            fits = blk <= budget_bytes
            key = (fits, blk if fits else -blk)  # biggest fitting, else smallest
            if best is None or key > best[0]:
                best = (key, tb, tt)
    return best[1], best[2]


@functools.partial(jax.jit, static_argnames=("x_block_budget_bytes",))
def probing_forward(x, lengths, w1, b1, w2, b2, layer=0, *,
                    x_block_budget_bytes=8 << 20):
    """x: (B, L, T, F) f32; returns (B, num_labels) logits.

    `lengths` is accepted but unused, exactly like the reference forward.
    # TODO(synk): if a length-masked mean is ever intended, feed per-example
    # lengths via SMEM and scale by 1/length instead of the static 1/T.
    """
    del lengths
    B, L, T, F = x.shape
    H = w1.shape[1]
    N = w2.shape[1]
    NP = max(128, -(-N // 128) * 128)   # lane-dense padded logits width
    assert F % 128 == 0 and H % 128 == 0

    tb, tt = _pick_tiles(B, T, F, x.dtype.itemsize, x_block_budget_bytes)
    grid = (B // tb, T // tt)           # (parallel batch, arbitrary time-red.)
    inv_t = 1.0 / float(T)

    # Tiny per-call parameter prep; cached/fused under jit.
    w1_bf = w1.astype(jnp.bfloat16)
    b1_f = b1.astype(jnp.float32).reshape(1, H)
    w2_p = jnp.zeros((H, NP), jnp.bfloat16).at[:, :N].set(
        w2.astype(jnp.bfloat16))
    b2_p = jnp.zeros((1, NP), jnp.float32).at[:, :N].set(
        b2.astype(jnp.float32).reshape(1, N))
    layer_idx = jnp.asarray(layer, dtype=jnp.int32).reshape(1)

    # Explicit VMEM budget: v5e/v6e default scoped limits are 16/32 MiB; on
    # v7x (64 MiB physical) the <=8 MiB x buffers keep the total well inside.
    x_blk_bytes = tb * tt * F * x.dtype.itemsize
    vmem_est = (2 * x_blk_bytes                      # x, double-buffered (f32)
                + 2 * (F * H + H * NP) * 2           # bf16 weights (dbl-buf)
                + 2 * (H + NP) * 4                   # f32 biases
                + 2 * tb * NP * 4                    # output, double-buffered
                + tb * F * 4)                        # f32 accumulator scratch
    vmem_limit = min(64 << 20, max(int(vmem_est * 1.5) + (2 << 20), 16 << 20))

    bytes_accessed = (B * T * F * x.dtype.itemsize   # only the selected layer
                      + (F * H + H * NP) * 2         # bf16 weights
                      + (H + NP) * 4                 # f32 biases
                      + B * NP * 4)                  # f32 output
    flops = 2 * B * (T * F + F * H + H * NP)

    out = pl.pallas_call(
        _probing_kernel(inv_t),
        out_shape=jax.ShapeDtypeStruct((B, NP), jnp.float32),
        grid_spec=pltpu.PrefetchScalarGridSpec(
            num_scalar_prefetch=1,
            grid=grid,
            in_specs=[
                # Probed layer selected via the scalar-prefetch ref; the layer
                # axis is squeezed out of the kernel view.  x stays f32, so
                # there is no extra full-stack HBM cast pass in the wrapper.
                pl.BlockSpec((tb, pl.Squeezed(), tt, F),
                             lambda b, t, lyr: (b, lyr[0], t, 0)),
                # Constant-index operands: DMA'd once, reused every grid step.
                pl.BlockSpec((F, H), lambda b, t, lyr: (0, 0)),
                pl.BlockSpec((1, H), lambda b, t, lyr: (0, 0)),
                pl.BlockSpec((H, NP), lambda b, t, lyr: (0, 0)),
                pl.BlockSpec((1, NP), lambda b, t, lyr: (0, 0)),
            ],
            out_specs=pl.BlockSpec((tb, NP), lambda b, t, lyr: (b, 0)),
            scratch_shapes=[pltpu.VMEM((tb, F), jnp.float32)],
        ),
        compiler_params=pltpu.CompilerParams(
            dimension_semantics=("parallel", "arbitrary"),
            vmem_limit_bytes=vmem_limit),
        cost_estimate=pl.CostEstimate(
            flops=flops, transcendentals=0, bytes_accessed=bytes_accessed),
    )(layer_idx, x, w1_bf, b1_f, w2_p, b2_p)

    return out[:, :N]


if __name__ == "__main__":
    # 'BASE' fx model -> feature_dim = 768, hidden_dim = 128
    B, L, T, F = 16, 4, 16, 768
    H, NUM_LABELS = 128, 16
    LAYER = 2

    key = jax.random.PRNGKey(0)
    kx, kw1, kb1, kw2, kb2, kl = jax.random.split(key, 6)

    x = jax.random.normal(kx, (B, L, T, F), dtype=jnp.float32)
    lengths = jax.random.randint(kl, (B,), 1, T + 1)  # unused (API parity)

    # nn.Linear-shaped params, stored transposed as (in, out).
    w1 = jax.random.normal(kw1, (F, H), dtype=jnp.float32) * 0.02
    b1 = jax.random.normal(kb1, (1, H), dtype=jnp.float32) * 0.02
    w2 = jax.random.normal(kw2, (H, NUM_LABELS), dtype=jnp.float32) * 0.02
    b2 = jax.random.normal(kb2, (1, NUM_LABELS), dtype=jnp.float32) * 0.02

    logits = probing_forward(x, lengths, w1, b1, w2, b2, layer=LAYER)
    logits = jax.block_until_ready(logits)

    # Pure-JAX f32 reference (module semantics).
    feat_ref = jnp.mean(x[:, LAYER, :, :], axis=1)
    h_ref = jnp.maximum(feat_ref @ w1 + b1, 0.0)
    ref = h_ref @ w2 + b2

    assert logits.shape == (B, NUM_LABELS)
    # f32 time-sum; bf16 MXU operands with f32 accumulation => tight tolerance.
    assert jnp.allclose(logits, ref, atol=2e-2, rtol=2e-2), (
        float(jnp.max(jnp.abs(logits - ref))))

    print("KERNEL_OK")
</pallas_src>

<mosaic_0001>
module attributes {stable_mosaic.version = 11 : i64} {
  func.func @kernel(%arg0: i32, %arg1: i32, %arg2: memref<1xi32, #tpu.memory_space<smem>>, %arg3: memref<8x1x16x768xf32, #tpu.memory_space<vmem>>, %arg4: memref<768x128xbf16, #tpu.memory_space<vmem>>, %arg5: memref<1x128xf32, #tpu.memory_space<vmem>>, %arg6: memref<128x128xbf16, #tpu.memory_space<vmem>>, %arg7: memref<1x128xf32, #tpu.memory_space<vmem>>, %arg8: memref<8x128xf32, #tpu.memory_space<vmem>>, %arg9: memref<8x768xf32, #tpu.memory_space<vmem>>) attributes {dimension_semantics = [#tpu.dimension_semantics<parallel>, #tpu.dimension_semantics<arbitrary>], iteration_bounds = array<i64: 2, 1>, scalar_prefetch = 1 : i64, scratch_operands = 1 : i64, tpu.core_type = #tpu.core_type<tc>, window_params = [{transform_indices = @transform_0, window_bounds = array<i64: 8, 1, 16, 768>}, {pipeline_mode = #tpu.pipeline_mode<synchronous>, transform_indices = @transform_1, window_bounds = array<i64: 768, 128>}, {pipeline_mode = #tpu.pipeline_mode<synchronous>, transform_indices = @transform_2, window_bounds = array<i64: 1, 128>}, {pipeline_mode = #tpu.pipeline_mode<synchronous>, transform_indices = @transform_3, window_bounds = array<i64: 128, 128>}, {pipeline_mode = #tpu.pipeline_mode<synchronous>, transform_indices = @transform_4, window_bounds = array<i64: 1, 128>}, {transform_indices = @transform_5, window_bounds = array<i64: 8, 128>}]} {
    %c0_i32 = arith.constant 0 : i32
    %0 = arith.cmpi eq, %arg1, %c0_i32 : i32
    %1 = arith.extui %0 : i1 to i32
    %c0_i32_0 = arith.constant 0 : i32
    %2 = arith.cmpi ne, %1, %c0_i32_0 : i32
    scf.if %2 {
      %cst_10 = arith.constant 0.000000e+00 : f32
      %12 = vector.broadcast %cst_10 : f32 to vector<8x768xf32>
      %c0_11 = arith.constant 0 : index
      %c0_12 = arith.constant 0 : index
      %13 = vector.load %arg9[%c0_11, %c0_12] : memref<8x768xf32, #tpu.memory_space<vmem>>, vector<8x768xf32>
      tpu.vector_store %arg9[%c0_11, %c0_12], %12 {strides = array<i32>} : memref<8x768xf32, #tpu.memory_space<vmem>>, vector<8x768xf32>,
    } else {
    }
    %c0 = arith.constant 0 : index
    %c0_1 = arith.constant 0 : index
    %3 = vector.load %arg9[%c0, %c0_1] : memref<8x768xf32, #tpu.memory_space<vmem>>, vector<8x768xf32>
    %c0_2 = arith.constant 0 : index
    %c0_3 = arith.constant 0 : index
    %c0_4 = arith.constant 0 : index
    %c0_5 = arith.constant 0 : index
    %4 = vector.load %arg3[%c0_2, %c0_3, %c0_4, %c0_5] : memref<8x1x16x768xf32, #tpu.memory_space<vmem>>, vector<8x1x16x768xf32>
    %5 = vector.shape_cast %4 : vector<8x1x16x768xf32> to vector<8x16x768xf32>
    %cst = arith.constant dense<0.000000e+00> : vector<8x768xf32>
    %6 = vector.multi_reduction <add>, %5, %cst [1] : vector<8x16x768xf32> to vector<8x768xf32>
    %7 = arith.addf %3, %6 : vector<8x768xf32>
    %c0_6 = arith.constant 0 : index
    %c0_7 = arith.constant 0 : index
    %8 = vector.load %arg9[%c0_6, %c0_7] : memref<8x768xf32, #tpu.memory_space<vmem>>, vector<8x768xf32>
    tpu.vector_store %arg9[%c0_6, %c0_7], %7 {strides = array<i32>} : memref<8x768xf32, #tpu.memory_space<vmem>>, vector<8x768xf32>,
    %c0_i32_8 = arith.constant 0 : i32
    %9 = arith.cmpi eq, %arg1, %c0_i32_8 : i32
    %10 = arith.extui %9 : i1 to i32
    %c0_i32_9 = arith.constant 0 : i32
    %11 = arith.cmpi ne, %10, %c0_i32_9 : i32
    scf.if %11 {
      %c0_10 = arith.constant 0 : index
      %c0_11 = arith.constant 0 : index
      %12 = vector.load %arg9[%c0_10, %c0_11] : memref<8x768xf32, #tpu.memory_space<vmem>>, vector<8x768xf32>
      %13 = arith.truncf %12 : vector<8x768xf32> to vector<8x768xbf16>
      %c0_12 = arith.constant 0 : index
      %c0_13 = arith.constant 0 : index
      %14 = vector.load %arg4[%c0_12, %c0_13] : memref<768x128xbf16, #tpu.memory_space<vmem>>, vector<768x128xbf16>
      %cst_14 = arith.constant dense<0.000000e+00> : vector<8x128xf32>
      %15 = tpu.matmul %13, %14, %cst_14 {dimension_numbers = #tpu.dot_dimension_numbers<[1], [0], [0], [1], [0, 0, 1, 1], [], []>} : vector<8x768xbf16>, vector<768x128xbf16>, vector<8x128xf32> -> vector<8x128xf32>
      %cst_15 = arith.constant 6.250000e-02 : f32
      %16 = vector.broadcast %cst_15 : f32 to vector<8x128xf32>
      %17 = arith.mulf %15, %16 : vector<8x128xf32>
      %c0_16 = arith.constant 0 : index
      %c0_17 = arith.constant 0 : index
      %18 = vector.load %arg5[%c0_16, %c0_17] : memref<1x128xf32, #tpu.memory_space<vmem>>, vector<1x128xf32>
      %19 = vector.broadcast %18 : vector<1x128xf32> to vector<8x128xf32>
      %20 = arith.addf %17, %19 : vector<8x128xf32>
      %cst_18 = arith.constant 0.000000e+00 : f32
      %21 = vector.broadcast %cst_18 : f32 to vector<8x128xf32>
      %22 = arith.maximumf %20, %21 : vector<8x128xf32>
      %23 = arith.truncf %22 : vector<8x128xf32> to vector<8x128xbf16>
      %c0_19 = arith.constant 0 : index
      %c0_20 = arith.constant 0 : index
      %24 = vector.load %arg6[%c0_19, %c0_20] : memref<128x128xbf16, #tpu.memory_space<vmem>>, vector<128x128xbf16>
      %cst_21 = arith.constant dense<0.000000e+00> : vector<8x128xf32>
      %25 = tpu.matmul %23, %24, %cst_21 {dimension_numbers = #tpu.dot_dimension_numbers<[1], [0], [0], [1], [0, 0, 1, 1], [], []>} : vector<8x128xbf16>, vector<128x128xbf16>, vector<8x128xf32> -> vector<8x128xf32>
      %c0_22 = arith.constant 0 : index
      %c0_23 = arith.constant 0 : index
      %26 = vector.load %arg7[%c0_22, %c0_23] : memref<1x128xf32, #tpu.memory_space<vmem>>, vector<1x128xf32>
      %27 = vector.broadcast %26 : vector<1x128xf32> to vector<8x128xf32>
      %28 = arith.addf %25, %27 : vector<8x128xf32>
      %c0_24 = arith.constant 0 : index
      %c0_25 = arith.constant 0 : index
      %29 = vector.load %arg8[%c0_24, %c0_25] : memref<8x128xf32, #tpu.memory_space<vmem>>, vector<8x128xf32>
      tpu.vector_store %arg8[%c0_24, %c0_25], %28 {strides = array<i32>} : memref<8x128xf32, #tpu.memory_space<vmem>>, vector<8x128xf32>,
    } else {
    }
    return
  }
  func.func @transform_0(%arg0: i32, %arg1: i32, %arg2: memref<1xi32, #tpu.memory_space<smem>>) -> (i32, i32, i32, i32) {
    %c0 = arith.constant 0 : index
    %0 = memref.load %arg2[%c0] : memref<1xi32, #tpu.memory_space<smem>>
    %c0_i32 = arith.constant 0 : i32
    %c0_i32_0 = arith.constant 0 : i32
    return %arg0, %0, %arg1, %c0_i32 : i32, i32, i32, i32
  }
  func.func @transform_1(%arg0: i32, %arg1: i32, %arg2: memref<1xi32, #tpu.memory_space<smem>>) -> (i32, i32) {
    %c0_i32 = arith.constant 0 : i32
    %c0_i32_0 = arith.constant 0 : i32
    %c0_i32_1 = arith.constant 0 : i32
    return %c0_i32, %c0_i32_0 : i32, i32
  }
  func.func @transform_2(%arg0: i32, %arg1: i32, %arg2: memref<1xi32, #tpu.memory_space<smem>>) -> (i32, i32) {
    %c0_i32 = arith.constant 0 : i32
    %c0_i32_0 = arith.constant 0 : i32
    %c0_i32_1 = arith.constant 0 : i32
    return %c0_i32, %c0_i32_0 : i32, i32
  }
  func.func @transform_3(%arg0: i32, %arg1: i32, %arg2: memref<1xi32, #tpu.memory_space<smem>>) -> (i32, i32) {
    %c0_i32 = arith.constant 0 : i32
    %c0_i32_0 = arith.constant 0 : i32
    %c0_i32_1 = arith.constant 0 : i32
    return %c0_i32, %c0_i32_0 : i32, i32
  }
  func.func @transform_4(%arg0: i32, %arg1: i32, %arg2: memref<1xi32, #tpu.memory_space<smem>>) -> (i32, i32) {
    %c0_i32 = arith.constant 0 : i32
    %c0_i32_0 = arith.constant 0 : i32
    %c0_i32_1 = arith.constant 0 : i32
    return %c0_i32, %c0_i32_0 : i32, i32
  }
  func.func @transform_5(%arg0: i32, %arg1: i32, %arg2: memref<1xi32, #tpu.memory_space<smem>>) -> (i32, i32) {
    %c0_i32 = arith.constant 0 : i32
    %c0_i32_0 = arith.constant 0 : i32
    return %arg0, %c0_i32 : i32, i32
  }
}

</mosaic_0001>

<bundles_post_ra>
// kernel: probing_forward.1
= control target key start
LH: loop header
LB: loop body
LE: loop exit
PB: predicated region body
PF: predicated region fallthrough
CT: control target
= control target key end

     0   :  { %s2675_s0 = inlined_call_operand.<no memory space> [shape: s32[1], index: 0, kind: input, shape index: {}]   ;;  %s2676_s1 = inlined_call_operand.hbm [shape: f32[16,4,16,768], index: 1, kind: input, shape index: {}]   ;;  %s2677_s2 = inlined_call_operand.vmem [shape: bf16[768,128], index: 2, kind: input, shape index: {}]   ;;  %s2678_s3 = inlined_call_operand.hbm [shape: f32[1,128], index: 3, kind: input, shape index: {}]   ;;  %s2679_s4 = inlined_call_operand.vmem [shape: bf16[128,128], index: 4, kind: input, shape index: {}]   ;;  %s2680_s5 = inlined_call_operand.vmem [shape: f32[1,128], index: 5, kind: input, shape index: {}]   ;;  %s2681_s6 = inlined_call_operand.hbm [shape: f32[16,128], index: 6, kind: output, shape index: {}]  }
   0x1   :  { %2695 = sst [smem:[#allocation25_spill]] %s2678_s3 }
   0x2   :  { %11 = sst [smem:[#allocation4]] %s2675_s0 }
   0x3   :  { %12 = vsyncpa [#allocation6], 0 }
   0x4   :  { %14 = vsyncpa [#allocation6 + $0x1], 0 }
   0x5   :  { %15 = vsyncpa [#allocation9], 0 }
   0x6   :  { %16 = vsyncpa [#allocation7], 0 }
   0x7   :  { %18 = vsyncpa [#allocation7 + $0x1], 0  ;;  %s2149_s23 = smov 0   ;;  %s2151_s24 = smov 0  }
   0x8   :  { %s2153_s25 = smov 0   ;;  %s2155_s26 = smov 0  }
   0x9   :  { %s2157_s27 = smov 0   ;;  %s2159_s28 = smov 0  }
   0xa   :  { %s2161_s29 = smov 0   ;;  %s2163_s0 = smov 0  }
   0xb   :  { %s2165_s30 = smov 0  }
   0xc LB: > { %2696 = sst [smem:[#allocation17_spill]] %s2075_s25  ;;  %s1624_s7 = sadd.s32 4294967295, %s2099_s30   ;;  %s2099_s30 = sphi %s2165_s30, %s24_s30   ;;  %s2095_s0 = sphi %s2163_s0, %s2725_s0   ;;  %s2091_s29 = sphi %s2161_s29, %s2724_s29   ;;  %s2087_s28 = sphi %s2159_s28, %s2723_s28   ;;  %s2083_s27 = sphi %s2157_s27, %s2729_s27   ;;  %s2079_s26 = sphi %s2155_s26, %s2728_s26   ;;  %s2075_s25 = sphi %s2153_s25, %s2721_s25   ;;  %s2071_s24 = sphi %s2151_s24, %s2727_s24   ;;  %s2067_s23 = sphi %s2149_s23, %s2726_s23  }
   0xd   : > { %2697 = sst [smem:[#allocation18_spill]] %s2087_s28  ;;  %s1625_s8 = sadd.s32 4294967294, %s2099_s30  }
   0xe   : > { %2698 = sst [smem:[#allocation19_spill]] %s2095_s0  ;;  %s36_s9 = sadd.s32 1, %s2095_s0 }
   0xf   : > { %2699 = sst [smem:[#allocation20_spill]] %s2099_s30  ;;  %p38_p0 = scmp.ge.s32.totalorder %s36_s9, 2 }
  0x10   : > { %s49_s10 = sadd.s32 1, %s2087_s28  ;;  %p56_p1 = scmp.ne.s32.totalorder %s2087_s28, %s2083_s27 }
  0x11   : > { %p57_p2 = scmp.eq.s32.totalorder %s2099_s30, 0  ;;  %s2731_s9 = smov (%p38_p0, %s36_s9), 0 }
  0x12   : > { %2700 = sst [smem:[#allocation21_spill]] %s2731_s9  ;;  %p62_p4 = scmp.ne.s32.totalorder %s2083_s27, %s2079_s26 }
  0x13   : > { %p2201_p3 = por %p57_p2, %p56_p1  ;;  %s42_s12 = ssub.s32 %s2095_s0, %s2731_s9 }
  0x14   : > { %p2208_p5 = scmp.eq.s32.totalorder %s1624_s7, 0  ;;  %p157_p6 = scmp.eq.s32.totalorder %s42_s12, 0 }
  0x15   : > { %s2701_s11 = scalar_select %p2201_p3, 1, 0 }
  0x16   : > { %s2702_s13 = scalar_select %p2208_p5, 1, 0 }
  0x17   : > { %p2214_p7 = por %p2208_p5, %p62_p4  ;;  %s159_s15 = sadd.s32 1, %s2075_s25 }
  0x18   : > { %s2220_s16 = scalar_select %p157_p6, %s2075_s25, %s159_s15  }
  0x19   : > { %s2703_s14 = scalar_select %p2214_p7, 1, 0 }
  0x1a   : > { %2704 = sst [smem:[#allocation22_spill]] %s2220_s16  ;;  %p169_p8 = scmp.ne.s32.totalorder %s2075_s25, %s2071_s24 }
  0x1b   : > { %s2223_s17 = scalar_select %p157_p6, %s2087_s28, %s49_s10  }
  0x1c   : > { %p170_p9 = scmp.eq.s32.totalorder %s1624_s7, 1  ;;  %p175_p10 = scmp.ne.s32.totalorder %s2071_s24, %s2067_s23 }
  0x1d   : > { %2705 = sst [smem:[#allocation23_spill]] %s2223_s17  ;;  %p176_p11 = scmp.eq.s32.totalorder %s1625_s8, 1 }
  0x1e   : > { %p2229_p12 = por %p170_p9, %p169_p8  ;;  %p1626_p13 = scmp.ge.s32.totalorder %s2099_s30, 1 }
  0x1f   : > { %p2234_p0 = por %p176_p11, %p175_p10  ;;  %p183_p1 = scmp.lt.s32.totalorder %s2099_s30, 3 }
  0x20   : > { %s2706_s18 = scalar_select %p2229_p12, 1, 0 }
  0x21   : > { %s2707_s19 = scalar_select %p2234_p0, 1, 0 }
  0x22   : > { %p2239_p2 = pnand %p1626_p13, %p183_p1  ;;  %s2101_s21 = smov [#allocation8]  }
  0x23   : > { %2708 = sst [smem:[#allocation24_spill]] %s2707_s19  ;;  %s199_s22 = sshll.u32 %s2101_s21, 4  ;;  %s200_s22 = int_to_ptr.vmem [resolvable:$true] %s199_s22 }
  0x24   : > { %s2709_s20 = scalar_select %p2239_p2, 1, 0 }
  0x25   : > { %p1813_p4 = pneg %p2239_p2  ;;  %s2711_s3 = sld [smem:[#allocation25_spill]] }
  0x27   : > { %p2247_p6 = pnand %p1813_p4, %p2208_p5 }
  0x29   : > { %p1963_p9 = pneg %p2247_p6 }
  0x2b   : > { %s1961_s10 = scalar_lea.hbm %s2711_s3, 16 }
  0x2c   : > { %p1962_p8 = scmp.ne.s32.totalorder %s2711_s3, %s1961_s10  ;;  %p1968_p13 = scmp.lt.u32.totalorder %s1961_s10, %s2711_s3 }
  0x2e   : > { %p1964_p10 = pnand %p1963_p9, %p1962_p8 }
  0x30   : > { %p1965_p11 = pneg %p1964_p10 }
  0x32   : > { %p1970_p1 = pnand %p1968_p13, %p1965_p11 }
  0x34   : > { %1973 = shalt.err (!%p1970_p1)
}
  0x35   : > { %s1974_s17 = scalar_lea.vmem %s200_s22, 16  ;;  %s1981_s7 = scalar_lea.vmem %s200_s22, 32 }
  0x36   : > { %p1975_p4 = scmp.ne.s32.totalorder %s200_s22, %s1974_s17  ;;  %p1982_p5 = scmp.lt.s32.totalorder %s200_s22, %s200_s22 }
  0x37   : > { %p1983_p7 = scmp.lt.s32.totalorder %s1981_s7, %s1974_s17 }
  0x38   : > { %p1977_p0 = pnand %p1975_p4, %p1963_p9 }
  0x39   : > { %p1984_p2 = por %p1983_p7, %p1982_p5 }
  0x3a   : > { %p1978_p12 = pneg %p1977_p0 }
  0x3c   : > { %p1985_p3 = pnand %p1984_p2, %p1978_p12 }
  0x3e   : > { %1988 = shalt.err (!%p1985_p3)
}
  0x3f   : > { %1816 = dma.hbm_to_vmem [thread:$0]  (!%p2247_p6), %s2711_s3, 16, %s200_s22, [#allocation9]  }
  0x40   : > { %p1628_p8 = scmp.ge.s32.totalorder %s2099_s30, 2 }
  0x42   : > { %212 = sbr.rel (%p1628_p8) target bundleno = 89 (0x59), region = 32 }
  0x49   : > { %s216_s9 = sand.u32 1, %s2087_s28   ;;  %s221_s17 = sld [smem:[#allocation4]] }
  0x4a   : > { %s1794_s10 = smul.u32 768, %s216_s9  ;;  %s2102_s26 = smov 6144  }
  0x4b   : > { %s1796_s15 = smul.u32 384, %s2095_s0  ;;  %p2712_p3 = scmp.ne.s32.totalorder %s2701_s11, 0 }
  0x4c   : > { %s220_s21 = scalar_lea.vmem [#allocation5], %s1794_s10  ;;  %s2103_s3 = smov 1536  }
  0x4d   : > { %1801 = sst [smem:[#allocation12]] (%p2712_p3), %s2102_s26  ;;  %s246_s7 = sshll.u32 %s220_s21, 4  ;;  %s247_s7 = int_to_ptr.vmem [resolvable:$true] %s246_s7 }
  0x4e   : > { %s1800_s22 = scalar_select %p2712_p3, [#allocation0], [#allocation13] }
  0x4f   : > { %s1795_s8 = smul.u32 12, %s221_s17  ;;  %1802 = sst [smem:[#allocation12 + $0x1]] (%p2712_p3), %s2103_s3 }
  0x50   : > { %s238_s12 = sld [smem:[%s1800_s22]]   ;;  %s2104_s0 = smov 2  }
  0x51   : > { %s231_s28 = sadd.s32 %s1796_s15, %s1795_s8  ;;  %1803 = sst [smem:[#allocation12 + $0x2]] (%p2712_p3), %s2104_s0 }
  0x52   : > { %s1631_s16 = sshll.u32 %s231_s28, 7  ;;  %s2105_s19 = smov 768  }
  0x53   : > { %s233_s30 = scalar_lea.hbm %s2676_s1, %s1631_s16  ;;  %1804 = sst [smem:[#allocation12 + $0x3]] (%p2712_p3), %s2105_s19 }
  0x54   : > { %1805 = sst [smem:[#allocation12 + $0x4]] (%p2712_p3), %s2105_s19  ;;  %s2106_s22 = smov 48  }
  0x55   : > { %1806 = sst [smem:[#allocation12 + $0x5]] (%p2712_p3), %s2106_s22  ;;  %s217_s3 = scalar_lea.sflag [#allocation6], %s216_s9 }
  0x56   : > { %s1632_s17 = sshll.u32 %s238_s12, 26  ;;  %s2107_s15 = smov [#allocation11]  }
  0x57   : > { %s1633_s10 = sadd.s32 134217728, %s1632_s17 }
  0x58   : > { %1807 = dma.general (%p2712_p3), %s233_s30, 12288, %s247_s7, %s217_s3, %s2107_s15, [#allocation12], %s1633_s10, 0  }
  0x59 PF: > { %p2713_p5 = scmp.ne.s32.totalorder %s2709_s20, 0 }
  0x5a   : > { %s273_s25 = sand.u32 (!%p2713_p5), 1, %s2083_s27   ;;  %p2714_p7 = scmp.ne.s32.totalorder (!%p2713_p5), %s2703_s14, 0 }
  0x5b   : > { %271 = sbr.rel (%p2713_p5) target bundleno = 677 (0x2a5), region = 40  ;;  %s274_s0 = scalar_lea.sflag (!%p2713_p5), [#allocation6], %s273_s25 }
  0x5c   : > { %s1797_s28 = smul.u32 (!%p2713_p5), 768, %s273_s25 }
  0x5e   : > { %s2294_s16 = scalar_lea.vmem (!%p2713_p5), [#allocation5], %s1797_s28 }
  0x62   : > { %2054 = dma.done.wait (%p2714_p7), %s274_s0, 12288  }
  0x63   : > { %2056 = vsyncadd (%p2714_p7), %s274_s0, 4294955008  ;;  %p2715_p12 = scmp.ne.s32.totalorder %s2702_s13, 0 }
  0x65   : > { %2058 = dma.done.wait (%p2715_p12), [#allocation9], 16  }
  0x66   : > { %2060 = vsyncadd (%p2715_p12), [#allocation9], 4294967280  ;;  %v1905_v0 = vld [vmem:[%s2677_s2 + $0x40] sm:$0xff]   ;;  %v1909_v4 = vld [vmem:[%s2677_s2 + $0x48] sm:$0xff]   ;;  %vm808_vm0 = vcmask 1041409   ;;  %vm810_vm1 = vcmask 1042434  }
  0x67   : > { %v1906_v1 = vld [vmem:[%s2677_s2 + $0xc0] sm:$0xff]   ;;  %1699 = vmatprep.subr.bf16.mxu0 %v1905_v0  ;;  %v1910_v5 = vld [vmem:[%s2677_s2 + $0xc8] sm:$0xff]   ;;  %v1913_v8 = vld [vmem:[%s2677_s2 + $0x50] sm:$0xff]   ;;  %vm812_vm2 = vcmask 1043459   ;;  %vm814_vm3 = vcmask 1044484   ;;  %vm816_vm4 = vcmask 1045509  }
  0x68   : > { %v1907_v2 = vld [vmem:[%s2677_s2] sm:$0xff]   ;;  %1721 = vmatprep.subr.bf16.mxu1 %v1906_v1  ;;  %v1911_v6 = vld [vmem:[%s2677_s2 + $0x8] sm:$0xff]   ;;  %v1914_v9 = vld [vmem:[%s2677_s2 + $0xd0] sm:$0xff]   ;;  %vm818_vm5 = vcmask 1046534   ;;  %vm820_vm6 = vcmask 1047559   ;;  %vm2109_vm7 = vmmov 0  }
  0x69   : > { %v1908_v3 = vld [vmem:[%s2677_s2 + $0x80] sm:$0xff]   ;;  %1700 = vmatpush3.bf16.msra.mxu0 %v1907_v2  ;;  %v1912_v7 = vld [vmem:[%s2677_s2 + $0x88] sm:$0xff]   ;;  %v1915_v10 = vld [vmem:[%s2677_s2 + $0x10] sm:$0xff]   ;;  %s305_s26 = sand.u32 1, %s2071_s24   ;;  %s1696_s3 = sshll.u32 %s2091_s29, 7 }
  0x6a   : > { %1722 = vmatpush3.bf16.msra.mxu1 %v1908_v3  ;;  %1701 = vmatprep.subr.bf16.mxu0 %v1909_v4  ;;  %v1916_v11 = vld [vmem:[%s2677_s2 + $0x90] sm:$0xff]   ;;  %v1917_v12 = vld [vmem:[%s2677_s2 + $0x58] sm:$0xff]   ;;  %v1921_v16 = vld [vmem:[%s2677_s2 + $0x60] sm:$0xff]   ;;  %s1636_s17 = sshll.u32 %s305_s26, 3  ;;  %s2618_s0 = scalar_lea.hbm %s2681_s6, %s1696_s3 }
  0x6b   : > { %1723 = vmatprep.subr.bf16.mxu1 %v1910_v5  ;;  %v1918_v13 = vld [vmem:[%s2677_s2 + $0xd8] sm:$0xff]   ;;  %v1922_v17 = vld [vmem:[%s2677_s2 + $0xe0] sm:$0xff]   ;;  %v1925_v20 = vld [vmem:[%s2677_s2 + $0x68] sm:$0xff]   ;;  %s1518_s30 = scalar_lea.sflag [#allocation7], %s305_s26  ;;  %p2716_p2 = scmp.ne.s32.totalorder %s2706_s18, 0 }
  0x6c   : > { %v1919_v14 = vld [vmem:[%s2677_s2 + $0x18] sm:$0xff]   ;;  %v1923_v18 = vld [vmem:[%s2677_s2 + $0x20] sm:$0xff]   ;;  %v1926_v21 = vld [vmem:[%s2677_s2 + $0xe8] sm:$0xff]   ;;  %s2110_s11 = smov [#allocation10]  }
  0x6d   : > { %1702 = vmatpush3.bf16.msra.mxu0 %v1911_v6  ;;  %v1920_v15 = vld [vmem:[%s2677_s2 + $0x98] sm:$0xff]   ;;  %v1924_v19 = vld [vmem:[%s2677_s2 + $0xa0] sm:$0xff]   ;;  %v1927_v22 = vld [vmem:[%s2677_s2 + $0x28] sm:$0xff]   ;;  %s1993_s19 = sshll.u32 %s2110_s11, 4  ;;  %s1994_s19 = int_to_ptr.vmem [resolvable:$false] %s1993_s19 }
  0x6e   : > { %1724 = vmatpush3.bf16.msra.mxu1 %v1912_v7  ;;  %1703 = vmatprep.subr.bf16.mxu0 %v1913_v8  ;;  %v1928_v23 = vld [vmem:[%s2677_s2 + $0xa8] sm:$0xff]   ;;  %v1929_v24 = vld [vmem:[%s2677_s2 + $0x70] sm:$0xff]   ;;  %v1933_v28 = vld [vmem:[%s2677_s2 + $0x78] sm:$0xff]   ;;  %s1995_s20 = scalar_lea.vmem %s1994_s19, 256 }
  0x6f   : > { %1725 = vmatprep.subr.bf16.mxu1 %v1914_v9  ;;  %v1930_v25 = vld [vmem:[%s2677_s2 + $0xf0] sm:$0xff]   ;;  %v1934_v29 = vld [vmem:[%s2677_s2 + $0xf8] sm:$0xff]   ;;  %v329_v32 = vld [vmem:[%s2294_s16 + $0x8] sm:$0xff] }
  0x70   : > { %v1931_v26 = vld [vmem:[%s2677_s2 + $0x30] sm:$0xff]   ;;  %v1935_v30 = vld [vmem:[%s2677_s2 + $0x38] sm:$0xff]   ;;  %v341_v34 = vld [vmem:[%s2294_s16 + $0x68] sm:$0xff] }
  0x71   : > { %1704 = vmatpush3.bf16.msra.mxu0 %v1915_v10  ;;  %v1932_v27 = vld [vmem:[%s2677_s2 + $0xb0] sm:$0xff]   ;;  %v1936_v31 = vld [vmem:[%s2677_s2 + $0xb8] sm:$0xff]   ;;  %v353_v36 = vld [vmem:[%s2294_s16 + $0xc8] sm:$0xff] }
  0x72   : > { %1726 = vmatpush3.bf16.msra.mxu1 %v1916_v11  ;;  %1705 = vmatprep.subr.bf16.mxu0 %v1917_v12  ;;  %v335_v33 = vld [vmem:[%s2294_s16 + $0x38] sm:$0xff]  ;;  %v365_v39 = vld [vmem:[%s2294_s16 + $0x128] sm:$0xff] }
  0x73   : > { %1727 = vmatprep.subr.bf16.mxu1 %v1918_v13  ;;  %v347_v35 = vld [vmem:[%s2294_s16 + $0x98] sm:$0xff]  ;;  %v431_v38 = vadd.f32 %v335_v33, %v329_v32  ;;  %v377_v41 = vld [vmem:[%s2294_s16 + $0x188] sm:$0xff] }
  0x74   : > { %v359_v37 = vld [vmem:[%s2294_s16 + $0xf8] sm:$0xff]  ;;  %v473_v42 = vadd.f32 %v347_v35, %v341_v34  ;;  %v389_v45 = vld [vmem:[%s2294_s16 + $0x1e8] sm:$0xff] }
  0x75   : > { %1706 = vmatpush3.bf16.msra.mxu0 %v1919_v14  ;;  %v371_v40 = vld [vmem:[%s2294_s16 + $0x158] sm:$0xff]  ;;  %v515_v43 = vadd.f32 %v359_v37, %v353_v36  ;;  %v432_v47 = vrot.slane %v431_v38, 4  ;;  %v401_v49 = vld [vmem:[%s2294_s16 + $0x248] sm:$0xff] }
  0x76   : > { %1728 = vmatpush3.bf16.msra.mxu1 %v1920_v15  ;;  %1707 = vmatprep.subr.bf16.mxu0 %v1921_v16  ;;  %v383_v44 = vld [vmem:[%s2294_s16 + $0x1b8] sm:$0xff]  ;;  %v557_v48 = vadd.f32 %v371_v40, %v365_v39  ;;  %v413_v51 = vld [vmem:[%s2294_s16 + $0x2a8] sm:$0xff]  ;;  %v474_v52 = vrot.slane %v473_v42, 4 }
  0x77   : > { %1729 = vmatprep.subr.bf16.mxu1 %v1922_v17  ;;  %v395_v46 = vld [vmem:[%s2294_s16 + $0x218] sm:$0xff]  ;;  %v516_v53 = vrot.slane %v515_v43, 4  ;;  %v599_v54 = vadd.f32 %v383_v44, %v377_v41  ;;  %v433_v57 = vadd.f32 %v432_v47, %v431_v38  ;;  %v361_v40 = vld [vmem:[%s2294_s16 + $0x108] sm:$0xff] }
  0x78   : > { %v407_v50 = vld [vmem:[%s2294_s16 + $0x278] sm:$0xff]  ;;  %v641_v55 = vadd.f32 %v395_v46, %v389_v45  ;;  %v558_v58 = vrot.slane %v557_v48, 4  ;;  %v475_v60 = vadd.f32 %v474_v52, %v473_v42  ;;  %v373_v42 = vld [vmem:[%s2294_s16 + $0x168] sm:$0xff] }
  0x79   : > { %1708 = vmatpush3.bf16.msra.mxu0 %v1923_v18  ;;  %v419_v56 = vld [vmem:[%s2294_s16 + $0x2d8] sm:$0xff]  ;;  %v683_v59 = vadd.f32 %v407_v50, %v401_v49  ;;  %v517_v61 = vadd.f32 %v516_v53, %v515_v43  ;;  %v600_v62 = vrot.slane %v599_v54, 4  ;;  %v434_v0 = vrot.slane %v433_v57, 2 }
  0x7a   : > { %1730 = vmatpush3.bf16.msra.mxu1 %v1924_v19  ;;  %1709 = vmatprep.subr.bf16.mxu0 %v1925_v20  ;;  %v642_v63 = vrot.slane %v641_v55, 4  ;;  %v559_v1 = vadd.f32 %v558_v58, %v557_v48  ;;  %v725_v3 = vadd.f32 %v419_v56, %v413_v51  ;;  %v476_v4 = vrot.slane %v475_v60, 2  ;;  %v355_v36 = vld [vmem:[%s2294_s16 + $0xd8] sm:$0xff]  ;;  %v385_v48 = vld [vmem:[%s2294_s16 + $0x1c8] sm:$0xff] }
  0x7b   : > { %1731 = vmatprep.subr.bf16.mxu1 %v1926_v21  ;;  %v684_v2 = vrot.slane %v683_v59, 4  ;;  %v518_v5 = vrot.slane %v517_v61, 2  ;;  %v601_v6 = vadd.f32 %v600_v62, %v599_v54  ;;  %v435_v8 = vadd.f32 %v434_v0, %v433_v57  ;;  %v367_v41 = vld [vmem:[%s2294_s16 + $0x138] sm:$0xff]  ;;  %v397_v56 = vld [vmem:[%s2294_s16 + $0x228] sm:$0xff] }
  0x7c   : > { %v643_v7 = vadd.f32 %v642_v63, %v641_v55  ;;  %v560_v9 = vrot.slane %v559_v1, 2  ;;  %v726_v11 = vrot.slane %v725_v3, 4  ;;  %v477_v12 = vadd.f32 %v476_v4, %v475_v60  ;;  %v379_v47 = vld [vmem:[%s2294_s16 + $0x198] sm:$0xff] }
  0x7d   : > { %1710 = vmatpush3.bf16.msra.mxu0 %v1927_v22  ;;  %v685_v10 = vadd.f32 %v684_v2, %v683_v59  ;;  %v519_v13 = vadd.f32 %v518_v5, %v517_v61  ;;  %v602_v14 = vrot.slane %v601_v6, 2  ;;  %v436_v16 = vrot.slane %v435_v8, 1  ;;  %v391_v55 = vld [vmem:[%s2294_s16 + $0x1f8] sm:$0xff]  ;;  %v409_v2 = vld [vmem:[%s2294_s16 + $0x288] sm:$0xff] }
  0x7e   : > { %1732 = vmatpush3.bf16.msra.mxu1 %v1928_v23  ;;  %1711 = vmatprep.subr.bf16.mxu0 %v1929_v24  ;;  %v644_v15 = vrot.slane %v643_v7, 2  ;;  %v561_v17 = vadd.f32 %v560_v9, %v559_v1  ;;  %v727_v19 = vadd.f32 %v726_v11, %v725_v3  ;;  %v478_v20 = vrot.slane %v477_v12, 1  ;;  %v331_v24 = vld [vmem:[%s2294_s16 + $0x18] sm:$0xff]  ;;  %v1937_v11 = vld [vmem:[%s2677_s2 + $0x140] sm:$0xff]  }
  0x7f   : > { %1733 = vmatprep.subr.bf16.mxu1 %v1930_v25  ;;  %v686_v18 = vrot.slane %v685_v10, 2  ;;  %v520_v21 = vrot.slane %v519_v13, 1  ;;  %v603_v22 = vadd.f32 %v602_v14, %v601_v6  ;;  %v337_v25 = vld [vmem:[%s2294_s16 + $0x48] sm:$0xff]  ;;  %v529_v58 = vadd.f32 %v361_v40, %v355_v36  ;;  %v403_v1 = vld [vmem:[%s2294_s16 + $0x258] sm:$0xff] }
  0x80   : > { %v645_v23 = vadd.f32 %v644_v15, %v643_v7  ;;  %v479_v32 = vadd.f32 %v478_v20, %v477_v12  ;;  %v445_v43 = vadd.f32 %v337_v25, %v331_v24  ;;  %v571_v59 = vadd.f32 %v373_v42, %v367_v41  ;;  %v415_v7 = vld [vmem:[%s2294_s16 + $0x2b8] sm:$0xff] }
  0x81   : > { %1712 = vmatpush3.bf16.msra.mxu0 %v1931_v26  ;;  %v437_v26 = vadd.f32 %v436_v16, %v435_v8  ;;  %v521_v33 = vadd.f32 %v520_v21, %v519_v13  ;;  %v604_v34 = vrot.slane %v603_v22, 1  ;;  %v613_v63 = vadd.f32 %v385_v48, %v379_v47  ;;  %v421_v13 = vld [vmem:[%s2294_s16 + $0x2e8] sm:$0xff] }
  0x82   : > { %1734 = vmatpush3.bf16.msra.mxu1 %v1932_v27  ;;  %1713 = vmatprep.subr.bf16.mxu0 %v1933_v28  ;;  %v562_v27 = vrot.slane %v561_v17, 1  ;;  %v687_v28 = vadd.f32 %v686_v18, %v685_v10  ;;  %v646_v35 = vrot.slane %v645_v23, 1  ;;  %v446_v53 = vrot.slane %v445_v43, 4 }
  0x83   : > { %1735 = vmatprep.subr.bf16.mxu1 %v1934_v29  ;;  %v728_v29 = vrot.slane %v727_v19, 2  ;;  %v605_v44 = vadd.f32 %v604_v34, %v603_v22  ;;  %v822_v46 = vsel %vm808_vm0, %v479_v32, %v437_v26  ;;  %v530_v4 = vrot.slane %v529_v58, 4 }
  0x84   : > { %v563_v37 = vadd.f32 %v562_v27, %v561_v17  ;;  %v688_v38 = vrot.slane %v687_v28, 1  ;;  %v647_v45 = vadd.f32 %v646_v35, %v645_v23  ;;  %v823_v52 = vsel %vm810_vm1, %v521_v33, %v822_v46 }
  0x85   : > { %1714 = vmatpush3.bf16.msra.mxu0 %v1935_v30  ;;  %v343_v30 = vld [vmem:[%s2294_s16 + $0x78] sm:$0xff]  ;;  %v729_v39 = vadd.f32 %v728_v29, %v727_v19  ;;  %v447_v62 = vadd.f32 %v446_v53, %v445_v43  ;;  %v572_v5 = vrot.slane %v571_v59, 4  ;;  %v614_v9 = vrot.slane %v613_v63, 4  ;;  %v328_v29 = vld [vmem:[%s2294_s16] sm:$0xff] }
  0x86   : > { %1736 = vmatpush3.bf16.msra.mxu1 %v1936_v31  ;;  %v349_v31 = vld [vmem:[%s2294_s16 + $0xa8] sm:$0xff]  ;;  %v689_v50 = vadd.f32 %v688_v38, %v687_v28  ;;  %v824_v54 = vsel %vm812_vm2, %v563_v37, %v823_v52  ;;  %v655_v10 = vadd.f32 %v397_v56, %v391_v55  ;;  %v531_v15 = vadd.f32 %v530_v4, %v529_v58  ;;  %v364_v55 = vld [vmem:[%s2294_s16 + $0x120] sm:$0xff]  ;;  %v370_v56 = vld [vmem:[%s2294_s16 + $0x150] sm:$0xff] }
  0x87   : > { %v487_v49 = vadd.f32 %v349_v31, %v343_v30  ;;  %v730_v51 = vrot.slane %v729_v39, 1  ;;  %v825_v61 = vsel %vm814_vm3, %v605_v44, %v824_v54  ;;  %v448_v8 = vrot.slane %v447_v62, 2  ;;  %1743 = vmatprep.subr.bf16.mxu0 %v1937_v11  ;;  %v334_v30 = vld [vmem:[%s2294_s16 + $0x30] sm:$0xff] }
  0x88   : > { %v826_v0 = vsel %vm816_vm4, %v647_v45, %v825_v61  ;;  %v573_v16 = vadd.f32 %v572_v5, %v571_v59  ;;  %v615_v19 = vadd.f32 %v614_v9, %v613_v63  ;;  %v656_v20 = vrot.slane %v655_v10, 4  ;;  %v346_v44 = vld [vmem:[%s2294_s16 + $0x90] sm:$0xff]  ;;  %v352_v45 = vld [vmem:[%s2294_s16 + $0xc0] sm:$0xff] }
  0x89   : > { %v488_v57 = vrot.slane %v487_v49, 4  ;;  %v731_v60 = vadd.f32 %v730_v51, %v729_v39  ;;  %v827_v6 = vsel %vm818_vm5, %v689_v50, %v826_v0  ;;  %v449_v18 = vadd.f32 %v448_v8, %v447_v62  ;;  %v340_v39 = vld [vmem:[%s2294_s16 + $0x60] sm:$0xff]  ;;  %v382_v61 = vld [vmem:[%s2294_s16 + $0x1b0] sm:$0xff] }
  0x8a   : > { %v532_v22 = vrot.slane %v531_v15, 2  ;;  %v574_v23 = vrot.slane %v573_v16, 2  ;;  %v697_v24 = vadd.f32 %v409_v2, %v403_v1  ;;  %v616_v26 = vrot.slane %v615_v19, 2 }
  0x8b   : > { %v489_v3 = vadd.f32 %v488_v57, %v487_v49  ;;  %v828_v12 = vsel %vm820_vm6, %v731_v60, %v827_v6  ;;  %v450_v25 = vrot.slane %v449_v18, 1  ;;  %v657_v27 = vadd.f32 %v656_v20, %v655_v10  ;;  %v358_v49 = vld [vmem:[%s2294_s16 + $0xf0] sm:$0xff]  ;;  %v376_v60 = vld [vmem:[%s2294_s16 + $0x180] sm:$0xff] }
  0x8c   : > { %v885_v17 = vpack.c.bf16 %v828_v12, %v828_v12  ;;  %v739_v28 = vadd.f32 %v421_v13, %v415_v7  ;;  %v533_v32 = vadd.f32 %v532_v22, %v531_v15  ;;  %v575_v33 = vadd.f32 %v574_v23, %v573_v16  ;;  %v388_v6 = vld [vmem:[%s2294_s16 + $0x1e0] sm:$0xff]  ;;  %v394_v10 = vld [vmem:[%s2294_s16 + $0x210] sm:$0xff] }
  0x8d   : > { %v490_v14 = vrot.slane %v489_v3, 2  ;;  %v698_v34 = vrot.slane %v697_v24, 4  ;;  %v451_v35 = vadd.f32 %v450_v25, %v449_v18  ;;  %v617_v36 = vadd.f32 %v616_v26, %v615_v19  ;;  %v400_v22 = vld [vmem:[%s2294_s16 + $0x240] sm:$0xff] }
  0x8e   : > { %1306 = vmatprep.mubr.bf16.mxu0 %v885_v17  ;;  %v658_v37 = vrot.slane %v657_v27, 2  ;;  %v740_v38 = vrot.slane %v739_v28, 4  ;;  %v534_v41 = vrot.slane %v533_v32, 1  ;;  %v576_v42 = vrot.slane %v575_v33, 1 }
  0x8f   : > { %v491_v21 = vadd.f32 %v490_v14, %v489_v3  ;;  %v699_v43 = vadd.f32 %v698_v34, %v697_v24  ;;  %v618_v46 = vrot.slane %v617_v36, 1  ;;  %v424_v50 = vadd.f32 %v334_v30, %v328_v29 }
  0x90   : > { %v659_v47 = vadd.f32 %v658_v37, %v657_v27  ;;  %v741_v48 = vadd.f32 %v740_v38, %v739_v28  ;;  %v535_v51 = vadd.f32 %v534_v41, %v533_v32  ;;  %v577_v52 = vadd.f32 %v576_v42, %v575_v33  ;;  %v406_v27 = vld [vmem:[%s2294_s16 + $0x270] sm:$0xff]  ;;  %v412_v32 = vld [vmem:[%s2294_s16 + $0x2a0] sm:$0xff] }
  0x91   : > { %v492_v31 = vrot.slane %v491_v21, 1  ;;  %v700_v53 = vrot.slane %v699_v43, 2  ;;  %v619_v57 = vadd.f32 %v618_v46, %v617_v36  ;;  %v425_v62 = vrot.slane %v424_v50, 4  ;;  %v418_v33 = vld [vmem:[%s2294_s16 + $0x2d0] sm:$0xff]  ;;  %v336_v42 = vld [vmem:[%s2294_s16 + $0x40] sm:$0xff] }
  0x92   : > { %v660_v58 = vrot.slane %v659_v47, 1  ;;  %v742_v59 = vrot.slane %v741_v48, 2  ;;  %v466_v1 = vadd.f32 %v346_v44, %v340_v39  ;;  %v508_v2 = vadd.f32 %v358_v49, %v352_v45  ;;  %v330_v41 = vld [vmem:[%s2294_s16 + $0x10] sm:$0xff] }
  0x93   : > { %v493_v40 = vadd.f32 %v492_v31, %v491_v21  ;;  %v701_v63 = vadd.f32 %v700_v53, %v699_v43  ;;  %v426_v7 = vadd.f32 %v425_v62, %v424_v50  ;;  %v550_v16 = vadd.f32 %v370_v56, %v364_v55  ;;  %v348_v55 = vld [vmem:[%s2294_s16 + $0xa0] sm:$0xff] }
  0x94   : > { %v661_v3 = vadd.f32 %v660_v58, %v659_v47  ;;  %v743_v4 = vadd.f32 %v742_v59, %v741_v48  ;;  %v467_v11 = vrot.slane %v466_v1, 4  ;;  %v509_v12 = vrot.slane %v508_v2, 4 }
  0x95   : > { %v836_v54 = vsel %vm808_vm0, %v493_v40, %v451_v35  ;;  %v702_v8 = vrot.slane %v701_v63, 1  ;;  %v427_v15 = vrot.slane %v426_v7, 2  ;;  %v592_v20 = vadd.f32 %v382_v61, %v376_v60 }
  0x96   : > { %v837_v0 = vsel %vm810_vm1, %v535_v51, %v836_v54  ;;  %v744_v13 = vrot.slane %v743_v4, 1  ;;  %v468_v18 = vadd.f32 %v467_v11, %v466_v1  ;;  %v510_v19 = vadd.f32 %v509_v12, %v508_v2  ;;  %v342_v54 = vld [vmem:[%s2294_s16 + $0x70] sm:$0xff] }
  0x97   : > { %v838_v5 = vsel %vm812_vm2, %v577_v52, %v837_v0  ;;  %v703_v17 = vadd.f32 %v702_v8, %v701_v63  ;;  %v428_v23 = vadd.f32 %v427_v15, %v426_v7  ;;  %v551_v24 = vrot.slane %v550_v16, 4 }
  0x98   : > { %v839_v9 = vsel %vm814_vm3, %v619_v57, %v838_v5  ;;  %v745_v21 = vadd.f32 %v744_v13, %v743_v4  ;;  %v634_v25 = vadd.f32 %v394_v10, %v388_v6  ;;  %v469_v28 = vrot.slane %v468_v18, 2  ;;  %v354_v4 = vld [vmem:[%s2294_s16 + $0xd0] sm:$0xff]  ;;  %v360_v5 = vld [vmem:[%s2294_s16 + $0x100] sm:$0xff] }
  0x99   : > { %v840_v14 = vsel %vm816_vm4, %v661_v3, %v839_v9  ;;  %v511_v29 = vrot.slane %v510_v19, 2  ;;  %v593_v30 = vrot.slane %v592_v20, 4  ;;  %v429_v34 = vrot.slane %v428_v23, 1  ;;  %v366_v13 = vld [vmem:[%s2294_s16 + $0x130] sm:$0xff] }
  0x9a   : > { %v841_v26 = vsel %vm818_vm5, %v703_v17, %v840_v14  ;;  %v552_v35 = vadd.f32 %v551_v24, %v550_v16  ;;  %v635_v36 = vrot.slane %v634_v25, 4  ;;  %v470_v38 = vadd.f32 %v469_v28, %v468_v18  ;;  %v372_v14 = vld [vmem:[%s2294_s16 + $0x160] sm:$0xff] }
  0x9b   : > { %v842_v31 = vsel %vm820_vm6, %v745_v21, %v841_v26  ;;  %v512_v39 = vadd.f32 %v511_v29, %v510_v19  ;;  %v594_v40 = vadd.f32 %v593_v30, %v592_v20  ;;  %v430_v43 = vadd.f32 %v429_v34, %v428_v23  ;;  %v378_v20 = vld [vmem:[%s2294_s16 + $0x190] sm:$0xff]  ;;  %v384_v21 = vld [vmem:[%s2294_s16 + $0x1c0] sm:$0xff] }
  0x9c   : > { %v887_v37 = vpack.c.bf16 %v842_v31, %v842_v31  ;;  %v553_v44 = vrot.slane %v552_v35, 2  ;;  %v636_v45 = vadd.f32 %v635_v36, %v634_v25  ;;  %v676_v46 = vadd.f32 %v406_v27, %v400_v22  ;;  %v390_v22 = vld [vmem:[%s2294_s16 + $0x1f0] sm:$0xff]  ;;  %v396_v26 = vld [vmem:[%s2294_s16 + $0x220] sm:$0xff] }
  0x9d   : > { %v471_v47 = vrot.slane %v470_v38, 1  ;;  %v513_v48 = vrot.slane %v512_v39, 1  ;;  %v595_v49 = vrot.slane %v594_v40, 2  ;;  %v718_v50 = vadd.f32 %v418_v33, %v412_v32 }
  0x9e   : > { %1346 = vmatprep.mubr.bf16.mxu1 %v887_v37  ;;  %v554_v51 = vadd.f32 %v553_v44, %v552_v35  ;;  %v637_v52 = vrot.slane %v636_v45, 2  ;;  %v677_v53 = vrot.slane %v676_v46, 4  ;;  %v438_v56 = vadd.f32 %v336_v42, %v330_v41  ;;  %v420_v41 = vld [vmem:[%s2294_s16 + $0x2e0] sm:$0xff] }
  0x9f   : > { %v472_v57 = vadd.f32 %v471_v47, %v470_v38  ;;  %v514_v58 = vadd.f32 %v513_v48, %v512_v39  ;;  %v596_v59 = vadd.f32 %v595_v49, %v594_v40  ;;  %v719_v60 = vrot.slane %v718_v50, 4  ;;  %v402_v38 = vld [vmem:[%s2294_s16 + $0x250] sm:$0xff]  ;;  %v408_v39 = vld [vmem:[%s2294_s16 + $0x280] sm:$0xff] }
  0xa0   : > { %v555_v61 = vrot.slane %v554_v51, 1  ;;  %v638_v62 = vadd.f32 %v637_v52, %v636_v45  ;;  %v678_v63 = vadd.f32 %v677_v53, %v676_v46  ;;  %v439_v0 = vrot.slane %v438_v56, 4  ;;  %v414_v40 = vld [vmem:[%s2294_s16 + $0x2b0] sm:$0xff]  ;;  %v1938_v49 = vld [vmem:[%s2677_s2 + $0x100] sm:$0xff]  }
  0xa1   : > { %v597_v1 = vrot.slane %v596_v59, 1  ;;  %v720_v2 = vadd.f32 %v719_v60, %v718_v50  ;;  %v809_v3 = vsel %vm808_vm0, %v472_v57, %v430_v43  ;;  %v480_v6 = vadd.f32 %v348_v55, %v342_v54  ;;  %v333_v50 = vld [vmem:[%s2294_s16 + $0x28] sm:$0xff] }
  0xa2   : > { %v556_v7 = vadd.f32 %v555_v61, %v554_v51  ;;  %v639_v8 = vrot.slane %v638_v62, 1  ;;  %v679_v9 = vrot.slane %v678_v63, 2  ;;  %v811_v10 = vsel %vm810_vm1, %v514_v58, %v809_v3 }
  0xa3   : > { %v598_v11 = vadd.f32 %v597_v1, %v596_v59  ;;  %v721_v12 = vrot.slane %v720_v2, 2  ;;  %v440_v15 = vadd.f32 %v439_v0, %v438_v56  ;;  %v481_v16 = vrot.slane %v480_v6, 4  ;;  %v339_v59 = vld [vmem:[%s2294_s16 + $0x58] sm:$0xff]  ;;  %v1939_v0 = vld [vmem:[%s2677_s2 + $0x148] sm:$0xff]  }
  0xa4   : > { %v640_v17 = vadd.f32 %v639_v8, %v638_v62  ;;  %v680_v18 = vadd.f32 %v679_v9, %v678_v63  ;;  %v813_v19 = vsel %vm812_vm2, %v556_v7, %v811_v10  ;;  %v522_v23 = vadd.f32 %v360_v5, %v354_v4  ;;  %v345_v8 = vld [vmem:[%s2294_s16 + $0x88] sm:$0xff]  ;;  %v351_v9 = vld [vmem:[%s2294_s16 + $0xb8] sm:$0xff] }
  0xa5   : > { %v722_v24 = vadd.f32 %v721_v12, %v720_v2  ;;  %v815_v25 = vsel %vm814_vm3, %v598_v11, %v813_v19  ;;  %v441_v27 = vrot.slane %v440_v15, 2  ;;  %v482_v28 = vadd.f32 %v481_v16, %v480_v6  ;;  %v1941_v19 = vld [vmem:[%s2677_s2 + $0x150] sm:$0xff]  }
  0xa6   : > { %v681_v29 = vrot.slane %v680_v18, 1  ;;  %v817_v30 = vsel %vm816_vm4, %v640_v17, %v815_v25  ;;  %v523_v31 = vrot.slane %v522_v23, 4  ;;  %v564_v32 = vadd.f32 %v372_v14, %v366_v13  ;;  %v363_v25 = vld [vmem:[%s2294_s16 + $0x118] sm:$0xff] }
  0xa7   : > { %v723_v33 = vrot.slane %v722_v24, 1  ;;  %v442_v34 = vadd.f32 %v441_v27, %v440_v15  ;;  %v483_v35 = vrot.slane %v482_v28, 2  ;;  %v606_v36 = vadd.f32 %v384_v21, %v378_v20  ;;  %v1940_v15 = vld [vmem:[%s2677_s2 + $0x108] sm:$0xff]  }
  0xa8   : > { %v682_v37 = vadd.f32 %v681_v29, %v680_v18  ;;  %v524_v42 = vadd.f32 %v523_v31, %v522_v23  ;;  %v565_v43 = vrot.slane %v564_v32, 4  ;;  %v648_v44 = vadd.f32 %v396_v26, %v390_v22 }
  0xa9   : > { %v724_v45 = vadd.f32 %v723_v33, %v722_v24  ;;  %v443_v46 = vrot.slane %v442_v34, 1  ;;  %v484_v47 = vadd.f32 %v483_v35, %v482_v28  ;;  %v607_v48 = vrot.slane %v606_v36, 4  ;;  %v357_v24 = vld [vmem:[%s2294_s16 + $0xe8] sm:$0xff] }
  0xaa   : > { %v819_v51 = vsel %vm818_vm5, %v682_v37, %v817_v30  ;;  %v525_v52 = vrot.slane %v524_v42, 2  ;;  %v566_v53 = vadd.f32 %v565_v43, %v564_v32  ;;  %v649_v54 = vrot.slane %v648_v44, 4  ;;  %v369_v35 = vld [vmem:[%s2294_s16 + $0x148] sm:$0xff] }
  0xab   : > { %v821_v55 = vsel %vm820_vm6, %v724_v45, %v819_v51  ;;  %v444_v56 = vadd.f32 %v443_v46, %v442_v34  ;;  %v485_v57 = vrot.slane %v484_v47, 1  ;;  %v608_v58 = vadd.f32 %v607_v48, %v606_v36  ;;  %v1942_v34 = vld [vmem:[%s2677_s2 + $0x110] sm:$0xff]   ;;  %v375_v36 = vld [vmem:[%s2294_s16 + $0x178] sm:$0xff]  ;;  %v393_v48 = vld [vmem:[%s2294_s16 + $0x208] sm:$0xff] }
  0xac   : > { %v884_v60 = vpack.c.bf16 %v821_v55, %v821_v55  ;;  %v526_v61 = vadd.f32 %v525_v52, %v524_v42  ;;  %v567_v62 = vrot.slane %v566_v53, 2  ;;  %v650_v63 = vadd.f32 %v649_v54, %v648_v44  ;;  %v387_v42 = vld [vmem:[%s2294_s16 + $0x1d8] sm:$0xff] }
  0xad   : > { %v486_v1 = vadd.f32 %v485_v57, %v484_v47  ;;  %v609_v2 = vrot.slane %v608_v58, 2  ;;  %v690_v3 = vadd.f32 %v408_v39, %v402_v38  ;;  %v732_v4 = vadd.f32 %v420_v41, %v414_v40  ;;  %v1943_v40 = vld [vmem:[%s2677_s2 + $0x158] sm:$0xff]   ;;  %v381_v41 = vld [vmem:[%s2294_s16 + $0x1a8] sm:$0xff] }
  0xae   : > { %1307 = vmatmul.mubr.bf16.vlgmr.msra.gmra.mrb[0].mxu0 %v884_v60  ;;  %v527_v5 = vrot.slane %v526_v61, 1  ;;  %v568_v6 = vadd.f32 %v567_v62, %v566_v53  ;;  %v651_v7 = vrot.slane %v650_v63, 2  ;;  %v459_v10 = vadd.f32 %v339_v59, %v333_v50  ;;  %v1944_v57 = vld [vmem:[%s2677_s2 + $0x118] sm:$0xff]   ;;  %v1945_v60 = vld [vmem:[%s2677_s2 + $0x160] sm:$0xff]  }
  0xaf   : > { %v610_v11 = vadd.f32 %v609_v2, %v608_v58  ;;  %v691_v12 = vrot.slane %v690_v3, 4  ;;  %v733_v13 = vrot.slane %v732_v4, 4  ;;  %v829_v14 = vsel %vm808_vm0, %v486_v1, %v444_v56  ;;  %1744 = vmatpush3.bf16.msra.mxu0 %v1938_v49  ;;  %v399_v49 = vld [vmem:[%s2294_s16 + $0x238] sm:$0xff] }
  0xb0   : > { %v528_v16 = vadd.f32 %v527_v5, %v526_v61  ;;  %v569_v17 = vrot.slane %v568_v6, 1  ;;  %v652_v18 = vadd.f32 %v651_v7, %v650_v63  ;;  %1745 = vmatprep.subr.bf16.mxu0 %v1939_v0  ;;  %v460_v20 = vrot.slane %v459_v10, 4  ;;  %v405_v61 = vld [vmem:[%s2294_s16 + $0x268] sm:$0xff]  ;;  %v411_v62 = vld [vmem:[%s2294_s16 + $0x298] sm:$0xff] }
  0xb1   : > { %v611_v21 = vrot.slane %v610_v11, 1  ;;  %v692_v22 = vadd.f32 %v691_v12, %v690_v3  ;;  %v734_v23 = vadd.f32 %v733_v13, %v732_v4  ;;  %v501_v26 = vadd.f32 %v351_v9, %v345_v8  ;;  %v1946_v12 = vld [vmem:[%s2677_s2 + $0x120] sm:$0xff]   ;;  %v417_v13 = vld [vmem:[%s2294_s16 + $0x2c8] sm:$0xff] }
  0xb2   : > { %v570_v27 = vadd.f32 %v569_v17, %v568_v6  ;;  %v653_v28 = vrot.slane %v652_v18, 1  ;;  %v830_v29 = vsel %vm810_vm1, %v528_v16, %v829_v14  ;;  %v461_v30 = vadd.f32 %v460_v20, %v459_v10  ;;  %v423_v14 = vld [vmem:[%s2294_s16 + $0x2f8] sm:$0xff] }
  0xb3   : > { %v612_v31 = vadd.f32 %v611_v21, %v610_v11  ;;  %v693_v32 = vrot.slane %v692_v22, 2  ;;  %v735_v33 = vrot.slane %v734_v23, 2  ;;  %1746 = vmatpush3.bf16.msra.mxu0 %v1940_v15  ;;  %v502_v37 = vrot.slane %v501_v26, 4 }
  0xb4   : > { %v654_v38 = vadd.f32 %v653_v28, %v652_v18  ;;  %v831_v39 = vsel %vm812_vm2, %v570_v27, %v830_v29  ;;  %1747 = vmatprep.subr.bf16.mxu0 %v1941_v19  ;;  %v462_v43 = vrot.slane %v461_v30, 2  ;;  %v543_v44 = vadd.f32 %v363_v25, %v357_v24  ;;  %v1947_v19 = vld [vmem:[%s2677_s2 + $0x168] sm:$0xff]   ;;  %v332_v27 = vld [vmem:[%s2294_s16 + $0x20] sm:$0xff] }
  0xb5   : > { %v694_v45 = vadd.f32 %v693_v32, %v692_v22  ;;  %v736_v46 = vadd.f32 %v735_v33, %v734_v23  ;;  %v832_v47 = vsel %vm814_vm3, %v612_v31, %v831_v39  ;;  %v503_v50 = vadd.f32 %v502_v37, %v501_v26  ;;  %v338_v32 = vld [vmem:[%s2294_s16 + $0x50] sm:$0xff]  ;;  %v344_v33 = vld [vmem:[%s2294_s16 + $0x80] sm:$0xff] }
  0xb6   : > { %v833_v51 = vsel %vm816_vm4, %v654_v38, %v832_v47  ;;  %v463_v52 = vadd.f32 %v462_v43, %v461_v30  ;;  %v544_v53 = vrot.slane %v543_v44, 4  ;;  %v585_v54 = vadd.f32 %v375_v36, %v369_v35  ;;  %v1948_v35 = vld [vmem:[%s2677_s2 + $0x128] sm:$0xff]   ;;  %v1949_v39 = vld [vmem:[%s2677_s2 + $0x170] sm:$0xff]  }
  0xb7   : > { %v695_v55 = vrot.slane %v694_v45, 1  ;;  %v737_v56 = vrot.slane %v736_v46, 1  ;;  %1748 = vmatpush3.bf16.msra.mxu0 %v1942_v34  ;;  %v504_v58 = vrot.slane %v503_v50, 2  ;;  %v627_v59 = vadd.f32 %v387_v42, %v381_v41  ;;  %v350_v34 = vld [vmem:[%s2294_s16 + $0xb0] sm:$0xff] }
  0xb8   : > { %1749 = vmatprep.subr.bf16.mxu0 %v1943_v40  ;;  %v464_v63 = vrot.slane %v463_v52, 1  ;;  %v545_v0 = vadd.f32 %v544_v53, %v543_v44  ;;  %v586_v1 = vrot.slane %v585_v54, 4  ;;  %v669_v2 = vadd.f32 %v399_v49, %v393_v48  ;;  %v362_v47 = vld [vmem:[%s2294_s16 + $0x110] sm:$0xff] }
  0xb9   : > { %v696_v3 = vadd.f32 %v695_v55, %v694_v45  ;;  %v738_v4 = vadd.f32 %v737_v56, %v736_v46  ;;  %v505_v5 = vadd.f32 %v504_v58, %v503_v50  ;;  %v628_v6 = vrot.slane %v627_v59, 4  ;;  %v356_v46 = vld [vmem:[%s2294_s16 + $0xe0] sm:$0xff]  ;;  %v374_v58 = vld [vmem:[%s2294_s16 + $0x170] sm:$0xff] }
  0xba   : > { %v465_v7 = vadd.f32 %v464_v63, %v463_v52  ;;  %v546_v8 = vrot.slane %v545_v0, 2  ;;  %v587_v9 = vadd.f32 %v586_v1, %v585_v54  ;;  %v670_v10 = vrot.slane %v669_v2, 4  ;;  %v1950_v54 = vld [vmem:[%s2677_s2 + $0x130] sm:$0xff]   ;;  %v380_v1 = vld [vmem:[%s2294_s16 + $0x1a0] sm:$0xff] }
  0xbb   : > { %v834_v11 = vsel %vm818_vm5, %v696_v3, %v833_v51  ;;  %1750 = vmatpush3.bf16.msra.mxu0 %v1944_v57  ;;  %v506_v15 = vrot.slane %v505_v5, 1  ;;  %v629_v16 = vadd.f32 %v628_v6, %v627_v59  ;;  %v711_v17 = vadd.f32 %v411_v62, %v405_v61  ;;  %v368_v57 = vld [vmem:[%s2294_s16 + $0x140] sm:$0xff]  ;;  %v1951_v61 = vld [vmem:[%s2677_s2 + $0x178] sm:$0xff]  }
  0xbc   : > { %v835_v18 = vsel %vm820_vm6, %v738_v4, %v834_v11  ;;  %1751 = vmatprep.subr.bf16.mxu0 %v1945_v60  ;;  %v547_v20 = vadd.f32 %v546_v8, %v545_v0  ;;  %v588_v21 = vrot.slane %v587_v9, 2  ;;  %v671_v22 = vadd.f32 %v670_v10, %v669_v2  ;;  %v386_v2 = vld [vmem:[%s2294_s16 + $0x1d0] sm:$0xff]  ;;  %v392_v6 = vld [vmem:[%s2294_s16 + $0x200] sm:$0xff] }
  0xbd   : > { %v886_v23 = vpack.c.bf16 %v835_v18, %v835_v18  ;;  %v507_v24 = vadd.f32 %v506_v15, %v505_v5  ;;  %v630_v25 = vrot.slane %v629_v16, 2  ;;  %v712_v26 = vrot.slane %v711_v17, 4 }
  0xbe   : > { %v548_v28 = vrot.slane %v547_v20, 1  ;;  %v589_v29 = vadd.f32 %v588_v21, %v587_v9  ;;  %v672_v30 = vrot.slane %v671_v22, 2  ;;  %v753_v31 = vadd.f32 %v423_v14, %v417_v13  ;;  %v1952_v14 = vld [vmem:[%s2677_s2 + $0x138] sm:$0xff]   ;;  %v410_v21 = vld [vmem:[%s2294_s16 + $0x290] sm:$0xff] }
  0xbf   : > { %1347 = vmatmul.mubr.bf16.vlgmr.msra.gmra.mrb[0].mxu1 %v886_v23  ;;  %1752 = vmatpush3.bf16.msra.mxu0 %v1946_v12  ;;  %v631_v36 = vadd.f32 %v630_v25, %v629_v16  ;;  %v713_v37 = vadd.f32 %v712_v26, %v711_v17  ;;  %v850_v38 = vsel %vm808_vm0, %v507_v24, %v465_v7  ;;  %v398_v7 = vld [vmem:[%s2294_s16 + $0x230] sm:$0xff] }
  0xc0   : > { %1753 = vmatprep.subr.bf16.mxu0 %v1947_v19  ;;  %v549_v40 = vadd.f32 %v548_v28, %v547_v20  ;;  %v590_v41 = vrot.slane %v589_v29, 1  ;;  %v673_v42 = vadd.f32 %v672_v30, %v671_v22  ;;  %v754_v43 = vrot.slane %v753_v31, 4  ;;  %v404_v20 = vld [vmem:[%s2294_s16 + $0x260] sm:$0xff] }
  0xc1   : > { %v632_v44 = vrot.slane %v631_v36, 1  ;;  %v714_v45 = vrot.slane %v713_v37, 2  ;;  %v452_v48 = vadd.f32 %v338_v32, %v332_v27  ;;  %v494_v49 = vadd.f32 %v350_v34, %v344_v33 }
  0xc2   : > { %v591_v50 = vadd.f32 %v590_v41, %v589_v29  ;;  %v674_v51 = vrot.slane %v673_v42, 1  ;;  %v755_v52 = vadd.f32 %v754_v43, %v753_v31  ;;  %v851_v53 = vsel %vm810_vm1, %v549_v40, %v850_v38  ;;  %v416_v38 = vld [vmem:[%s2294_s16 + $0x2c0] sm:$0xff] }
  0xc3   : > { %1754 = vmatpush3.bf16.msra.mxu0 %v1948_v35  ;;  %v633_v55 = vadd.f32 %v632_v44, %v631_v36  ;;  %v715_v56 = vadd.f32 %v714_v45, %v713_v37  ;;  %v453_v59 = vrot.slane %v452_v48, 4  ;;  %v495_v60 = vrot.slane %v494_v49, 4 }
  0xc4   : > { %1755 = vmatprep.subr.bf16.mxu0 %v1949_v39  ;;  %v675_v62 = vadd.f32 %v674_v51, %v673_v42  ;;  %v756_v63 = vrot.slane %v755_v52, 2  ;;  %v852_v0 = vsel %vm812_vm2, %v591_v50, %v851_v53  ;;  %v536_v3 = vadd.f32 %v362_v47, %v356_v46  ;;  %v422_v39 = vld [vmem:[%s2294_s16 + $0x2f0] sm:$0xff]  ;;  %s307_s16 = scalar_lea.vmem [#allocation10], %s1636_s17 }
  0xc5   : > { %v716_v4 = vrot.slane %v715_v56, 1  ;;  %v853_v5 = vsel %vm814_vm3, %v633_v55, %v852_v0  ;;  %v454_v8 = vadd.f32 %v453_v59, %v452_v48  ;;  %v496_v9 = vadd.f32 %v495_v60, %v494_v49  ;;  %s1531_s15 = sshll.u32 %s307_s16, 4  ;;  %s2620_s15 = int_to_ptr.vmem [resolvable:$true] %s1531_s15 }
  0xc6   : > { %v757_v10 = vadd.f32 %v756_v63, %v755_v52  ;;  %v854_v11 = vsel %vm816_vm4, %v675_v62, %v853_v5  ;;  %v537_v12 = vrot.slane %v536_v3, 4  ;;  %v578_v13 = vadd.f32 %v374_v58, %v368_v57  ;;  %s1989_s29 = scalar_lea.vmem %s2620_s15, 128  ;;  %p1996_p10 = scmp.lt.s32.totalorder %s2620_s15, %s1994_s19 }
  0xc7   : > { %1756 = vmatpush3.bf16.msra.mxu0 %v1950_v54  ;;  %v717_v15 = vadd.f32 %v716_v4, %v715_v56  ;;  %v455_v16 = vrot.slane %v454_v8, 2  ;;  %v497_v17 = vrot.slane %v496_v9, 2  ;;  %v620_v18 = vadd.f32 %v386_v2, %v380_v1  ;;  %p1990_p0 = scmp.ne.s32.totalorder %s2620_s15, %s1989_s29  ;;  %p1997_p11 = scmp.lt.s32.totalorder %s1995_s20, %s1989_s29 }
  0xc8   : > { %1757 = vmatprep.subr.bf16.mxu0 %v1951_v61  ;;  %v758_v19 = vrot.slane %v757_v10, 1  ;;  %v538_v22 = vadd.f32 %v537_v12, %v536_v3  ;;  %v579_v23 = vrot.slane %v578_v13, 4  ;;  %v662_v24 = vadd.f32 %v398_v7, %v392_v6 }
  0xc9   : > { %v855_v25 = vsel %vm818_vm5, %v717_v15, %v854_v11  ;;  %v456_v26 = vadd.f32 %v455_v16, %v454_v8  ;;  %v498_v27 = vadd.f32 %v497_v17, %v496_v9  ;;  %v621_v28 = vrot.slane %v620_v18, 4  ;;  %v1953_v16 = vld [vmem:[%s2679_s4] sm:$0xff]   ;;  %p1991_p6 = pnand %p1990_p0, %p2716_p2  ;;  %p1998_p13 = por %p1997_p11, %p1996_p10 }
  0xca   : > { %v759_v29 = vadd.f32 %v758_v19, %v757_v10  ;;  %v539_v30 = vrot.slane %v538_v22, 2  ;;  %v580_v31 = vadd.f32 %v579_v23, %v578_v13  ;;  %v663_v32 = vrot.slane %v662_v24, 4  ;;  %v1955_v19 = vld [vmem:[%s2679_s4 + $0x10] sm:$0xff]  }
  0xcb   : > { %1758 = vmatpush3.bf16.msra.mxu0 %v1952_v14  ;;  %v457_v33 = vrot.slane %v456_v26, 1  ;;  %v499_v34 = vrot.slane %v498_v27, 1  ;;  %v622_v35 = vadd.f32 %v621_v28, %v620_v18  ;;  %v704_v36 = vadd.f32 %v410_v21, %v404_v20  ;;  %v1954_v18 = vld [vmem:[%s2679_s4 + $0x8] sm:$0xff]   ;;  %v1956_v20 = vld [vmem:[%s2679_s4 + $0x18] sm:$0xff]   ;;  %v1957_v21 = vld [vmem:[%s2679_s4 + $0x20] sm:$0xff]   ;;  %p1992_p9 = pneg %p1991_p6 }
  0xcc   : > { %v856_v37 = vsel %vm820_vm6, %v759_v29, %v855_v25  ;;  %v540_v40 = vadd.f32 %v539_v30, %v538_v22  ;;  %v581_v41 = vrot.slane %v580_v31, 2  ;;  %v664_v42 = vadd.f32 %v663_v32, %v662_v24  ;;  %v1958_v22 = vld [vmem:[%s2679_s4 + $0x28] sm:$0xff]   ;;  %v1959_v23 = vld [vmem:[%s2679_s4 + $0x30] sm:$0xff]   ;;  %v1960_v24 = vld [vmem:[%s2679_s4 + $0x38] sm:$0xff]  }
  0xcd   : > { %v889_v43 = vpack.c.bf16 %v856_v37, %v856_v37  ;;  %v458_v44 = vadd.f32 %v457_v33, %v456_v26  ;;  %v500_v45 = vadd.f32 %v499_v34, %v498_v27  ;;  %v623_v46 = vrot.slane %v622_v35, 2  ;;  %p1999_p1 = pnand %p1998_p13, %p1992_p9 }
  0xce   : > { %v541_v47 = vrot.slane %v540_v40, 1  ;;  %v582_v48 = vadd.f32 %v581_v41, %v580_v31  ;;  %v665_v49 = vrot.slane %v664_v42, 2  ;;  %v705_v50 = vrot.slane %v704_v36, 4 }
  0xcf   : > { %1386 = vmatprep.mubr.bf16.mxu0 %v889_v43  ;;  %v624_v51 = vadd.f32 %v623_v46, %v622_v35  ;;  %v746_v52 = vadd.f32 %v422_v39, %v416_v38  ;;  %v843_v53 = vsel %vm808_vm0, %v500_v45, %v458_v44  ;;  %v2108_v17 = vmov 0.0  }
  0xd0   : > { %v542_v54 = vadd.f32 %v541_v47, %v540_v40  ;;  %v583_v55 = vrot.slane %v582_v48, 1  ;;  %v666_v56 = vadd.f32 %v665_v49, %v664_v42  ;;  %v706_v57 = vadd.f32 %v705_v50, %v704_v36  ;;  %1774 = vmatprep.subr.bf16.mxu1 %v2108_v17  ;;  %1790 = vmatprep.mubr.msk.bf16.mxu1 %vm2109_vm7, %v2108_v17  ;;  %v1685_v42 = vld [vmem:[#allocation8] ss:$0 sm:$0xff] }
  0xd1   : > { %v625_v58 = vrot.slane %v624_v51, 1  ;;  %v747_v59 = vrot.slane %v746_v52, 4  ;;  %1775 = vmatpush3.bf16.msra.mxu1 %v1953_v16  ;;  %v1686_v47 = vld [vmem:[%s2680_s5] ss:$0 sm:$0xff] }
  0xd2   : > { %v584_v60 = vadd.f32 %v583_v55, %v582_v48  ;;  %v667_v61 = vrot.slane %v666_v56, 1  ;;  %v707_v62 = vrot.slane %v706_v57, 2  ;;  %v844_v63 = vsel %vm810_vm1, %v542_v54, %v843_v53  ;;  %1776 = vmatprep.subr.bf16.mxu1 %v2108_v17 }
  0xd3   : > { %v626_v0 = vadd.f32 %v625_v58, %v624_v51  ;;  %v748_v1 = vadd.f32 %v747_v59, %v746_v52 }
  0xd4   : > { %v668_v2 = vadd.f32 %v667_v61, %v666_v56  ;;  %v708_v3 = vadd.f32 %v707_v62, %v706_v57  ;;  %v845_v4 = vsel %vm812_vm2, %v584_v60, %v844_v63 }
  0xd5   : > { %v749_v5 = vrot.slane %v748_v1, 2  ;;  %v846_v6 = vsel %vm814_vm3, %v626_v0, %v845_v4  ;;  %1777 = vmatpush3.bf16.msra.mxu1 %v1954_v18 }
  0xd6   : > { %v709_v7 = vrot.slane %v708_v3, 1  ;;  %v847_v9 = vsel %vm816_vm4, %v668_v2, %v846_v6  ;;  %1778 = vmatprep.subr.bf16.mxu1 %v2108_v17 }
  0xd7   : > { %v750_v8 = vadd.f32 %v749_v5, %v748_v1 }
  0xd8   : > { %v710_v10 = vadd.f32 %v709_v7, %v708_v3 }
  0xd9   : > { %v751_v11 = vrot.slane %v750_v8, 1  ;;  %1779 = vmatpush3.bf16.msra.mxu1 %v1955_v19 }
  0xda   : > { %v848_v12 = vsel %vm818_vm5, %v710_v10, %v847_v9  ;;  %1780 = vmatprep.subr.bf16.mxu1 %v2108_v17 }
  0xdb   : > { %v752_v13 = vadd.f32 %v751_v11, %v750_v8 }
  0xdd   : > { %v849_v14 = vsel %vm820_vm6, %v752_v13, %v848_v12  ;;  %1781 = vmatpush3.bf16.msra.mxu1 %v1956_v20 }
  0xde   : > { %v888_v15 = vpack.c.bf16 %v849_v14, %v849_v14  ;;  %1782 = vmatprep.subr.bf16.mxu1 %v2108_v17 }
  0xe0   : > { %1387 = vmatmul.mubr.bf16.vlgmr.msra.gmra.mrb[4].mxu0 %v888_v15 }
  0xe1   : > { %1783 = vmatpush3.bf16.msra.mxu1 %v1957_v21 }
  0xe2   : > { %1784 = vmatprep.subr.bf16.mxu1 %v2108_v17 }
  0xe5   : > { %1785 = vmatpush3.bf16.msra.mxu1 %v1958_v22 }
  0xe6   : > { %1786 = vmatprep.subr.bf16.mxu1 %v2108_v17 }
  0xe9   : > { %1787 = vmatpush3.bf16.msra.mxu1 %v1959_v23 }
  0xea   : > { %1788 = vmatprep.subr.bf16.mxu1 %v2108_v17 }
  0xed   : > { %1789 = vmatpush3.bf16.msra.mxu1 %v1960_v24 }
 0x181   : > { %v1715_v25 = vpop.f32.mrb[0].mxu0 }
 0x182   : > { %v1716_v26 = vpop.f32.mrb[1].mxu0 }
 0x183   : > { %v1717_v27 = vadd.f32 %v1716_v26, %v1715_v25  ;;  %v1718_v28 = vpop.f32.mrb[2].mxu0 }
 0x184   : > { %v1719_v29 = vpop.f32.mrb[3].mxu0 }
 0x192   : > { %v1737_v30 = vpop.f32.mrb[0].mxu1 }
 0x193   : > { %v1738_v31 = vpop.f32.mrb[1].mxu1 }
 0x194   : > { %v1739_v32 = vadd.f32 %v1738_v31, %v1737_v30  ;;  %v1740_v33 = vpop.f32.mrb[2].mxu1 }
 0x195   : > { %v1741_v34 = vpop.f32.mrb[3].mxu1 }
 0x196   : > { %v1349_v35 = vadd.f32 %v1739_v32, %v1717_v27 }
 0x1b3   : > { %v1759_v36 = vpop.f32.mrb[4].mxu0 }
 0x1b4   : > { %v1760_v37 = vpop.f32.mrb[5].mxu0 }
 0x1b5   : > { %v1761_v38 = vadd.f32 %v1760_v37, %v1759_v36  ;;  %v1762_v39 = vpop.f32.mrb[6].mxu0 }
 0x1b6   : > { %v1763_v40 = vpop.f32.mrb[7].mxu0 }
 0x1b7   : > { %v1389_v41 = vadd.f32 %v1761_v38, %v1349_v35 }
 0x1b9   : > { %v1394_v43 = vmul.f32 0.0625, %v1389_v41 }
 0x1bb   : > { %v1402_v44 = vadd.f32 %v1685_v42, %v1394_v43 }
 0x1bd   : > { %v1403_v45 = vmax.f32 %v1402_v44, 0.0 }
 0x1bf   : > { %v1404_v46 = vpack.c.bf16 %v1403_v45, %v1403_v45 }
 0x1c1   : > { %1791 = vmatmul.mubr.bf16.vlgmr.msra.gmra.mrb[4].mxu1 %v1404_v46 }
 0x294   : > { %v1510_v48 = vpop.f32.mrb[4].mxu1 }
 0x295   : > { %v1511_v49 = vadd.f32 %v1686_v47, %v1510_v48  ;;  %v1792_v50 = vpop.f32.mrb[5].mxu1 }
 0x296   : > { %v1513_v51 = vpop.f32.mrb[6].mxu1 }
 0x297   : > { %1516 = vst [vmem:[%s307_s16] sm:$0xff] %v1511_v49  ;;  %v1793_v52 = vpop.f32.mrb[7].mxu1 }
 0x298   : > { %2002 = shalt.err (!%p1999_p1)
}
 0x299   : > { %s2003_s9 = scalar_lea.hbm %s2618_s0, 128  ;;  %s2007_s7 = scalar_lea.hbm %s2681_s6, 256 }
 0x29a   : > { %p2004_p4 = scmp.ne.s32.totalorder %s2618_s0, %s2003_s9  ;;  %p2008_p7 = scmp.lt.u32.totalorder %s2618_s0, %s2681_s6 }
 0x29b   : > { %p2009_p12 = scmp.lt.u32.totalorder %s2007_s7, %s2003_s9  ;;  %p2011_p6 = scmp.lt.u32.totalorder %s2003_s9, %s2618_s0 }
 0x29c   : > { %p2005_p3 = pnand %p2004_p4, %p2716_p2 }
 0x29d   : > { %p2010_p0 = por %p2009_p12, %p2008_p7 }
 0x29e   : > { %p2006_p5 = pneg %p2005_p3 }
 0x29f   : > { %p2012_p9 = por %p2011_p6, %p2010_p0 }
 0x2a1   : > { %p2013_p10 = pnand %p2012_p9, %p2006_p5 }
 0x2a3   : > { %2016 = shalt.err (!%p2013_p10)
}
 0x2a4   : > { %1811 = dma.vmem_to_hbm [thread:$0]  (%p2716_p2), %s2620_s15, 128, %s2618_s0, %s1518_s30  }
 0x2a5 PF: > { %s2717_s12 = sld [smem:[#allocation24_spill]]  ;;  %s2718_s26 = sld [smem:[#allocation20_spill]] }
 0x2a6   : > { %s1543_s17 = sand.u32 1, %s2067_s23  }
 0x2a7   : > { %s1544_s10 = scalar_lea.sflag [#allocation7], %s1543_s17 }
 0x2ab   : > { %p2719_p11 = scmp.ne.s32.totalorder %s2717_s12, 0 }
 0x2ad   : > { %p1818_p13 = pnand %p1628_p8, %p2719_p11 }
 0x2af   : > { %2062 = dma.done.wait (!%p1818_p13), %s1544_s10, 128  }
 0x2b0   : > { %2064 = vsyncadd (!%p1818_p13), %s1544_s10, 4294967168  ;;  %s24_s30 = sadd.s32 1, %s2718_s26   ;;  %s2720_s22 = sld [smem:[#allocation17_spill]] }
 0x2b1   : > { %p21_p1 = scmp.ge.s32.totalorder %s24_s30, 4   ;;  %s2721_s25 = sld [smem:[#allocation22_spill]] }
 0x2b2   : > { %s2722_s18 = sld [smem:[#allocation18_spill]]  ;;  %s2723_s28 = sld [smem:[#allocation23_spill]] }
 0x2b3   : > { %s2724_s29 = sld [smem:[#allocation19_spill]]  ;;  %s2725_s0 = sld [smem:[#allocation21_spill]] }
 0x2b4   : > { %s2726_s23 = smov %s2071_s24  ;;  %s2728_s26 = smov %s2083_s27 }
 0x2b5   :  { %23 = sbr.rel (!%p21_p1) target bundleno = 12 (0xc), region = 102 }
 0x2b6   : > { %s2727_s24 = smov %s2720_s22 }
 0x2b8   : > { %s2729_s27 = smov %s2722_s18 }
 0x2bc   :  { %1549 = vsyncpa [#allocation6], 1 }
 0x2bd   :  { %1551 = vsyncpa [#allocation6 + $0x1], 1 }
 0x2be   :  { %1552 = vsyncpa [#allocation9], 1 }
 0x2bf   :  { %1553 = vsyncpa [#allocation7], 1 }
 0x2c0   :  { %1555 = vsyncpa [#allocation7 + $0x1], 1 }

</bundles_post_ra>
